<compile_context>
chip_gen: v7x
topology: tpu7x:2x2x1
jax: 0.10.0
libtpu: 0.0.40
codegen_flags: <defaults>
</compile_context>

<pallas_src>
import functools

import jax
import jax.numpy as jnp
from jax.experimental import pallas as pl
from jax.experimental.pallas import tpu as pltpu

LANE = 128
A_PAD = 128   # lane-dense width of each output head (mean / std)


def _round_up(n, m):
    return ((n + m - 1) // m) * m


# --------------------------------------------------------------------------
# Kernel
# --------------------------------------------------------------------------
def actor_kernel(
    x_ref,     # (TB, S)        bf16  state rows for this grid step
    w1_ref,    # (S, Hp)        bf16  fc1 weight (pre-transposed, zero-padded)
    v1_ref,    # (3, Hp)        f32   [b1; gamma1; beta1]  (pads are zero)
    w2_ref,    # (Hp, Hp)       bf16  fc2 weight
    v2_ref,    # (3, Hp)        f32   [b2; gamma2; beta2]
    wh_ref,    # (Hp, 2*A_PAD)  bf16  [mean_head.T | log_std_head.T]
    bh_ref,    # (1, 2*A_PAD)   f32   [bm | bs]
    mean_ref,  # (TB, A_PAD)    f32
    std_ref,   # (TB, A_PAD)    f32
    *, inv_h, a_pad,
):
    eps = 1e-5                      # torch.nn.LayerNorm default

    def layernorm_relu(h, v):
        # One-pass statistics over the *true* H lanes.  Padded lanes carry
        # exact zeros (zero-padded weight columns / bias / gamma / beta), so
        # they contribute 0 to both sums and stay 0 through
        # (h - mu) * scale + beta and relu.
        b, g, be = v[0:1, :], v[1:2, :], v[2:3, :]
        h = h + b
        s = jnp.sum(h, axis=-1, keepdims=True)
        s2 = jnp.sum(h * h, axis=-1, keepdims=True)
        mu = s * inv_h
        var = jnp.maximum(s2 * inv_h - mu * mu, 0.0)   # guard cancellation
        scale = jax.lax.rsqrt(var + eps) * g           # gamma folded in
        h = (h - mu) * scale + be
        return jnp.maximum(h, 0.0)

    x = x_ref[...]                                     # already bf16

    # ----- fc1 + ln1 + relu -----
    h = jnp.dot(x, w1_ref[...], preferred_element_type=jnp.float32)
    h = layernorm_relu(h, v1_ref[...])

    # ----- fc2 + ln2 + relu -----
    h = jnp.dot(h.astype(jnp.bfloat16), w2_ref[...],
                preferred_element_type=jnp.float32)
    h = layernorm_relu(h, v2_ref[...])

    # ----- fused heads: one matmul, two lane-aligned unmasked stores -----
    head = jnp.dot(h.astype(jnp.bfloat16), wh_ref[...],
                   preferred_element_type=jnp.float32) + bh_ref[...]
    mean_ref[...] = head[:, :a_pad].astype(mean_ref.dtype)
    std_ref[...] = jnp.exp(head[:, a_pad:]).astype(std_ref.dtype)


# --------------------------------------------------------------------------
# Host-side wrapper
# --------------------------------------------------------------------------
def _const_spec(shape):
    """BlockSpec for a grid-invariant operand (weights / LN vectors).

    Constant index map -> Pallas fetches the block once and keeps it resident
    across grid steps; Buffered(1) drops the useless second buffer, halving
    the resident-weight VMEM footprint (matters at production H on v7x's
    64 MiB VMEM).  Falls back to default pipelining on older JAX.
    """
    index_map = lambda i: (0,) * len(shape)
    try:
        return pl.BlockSpec(shape, index_map, pipeline_mode=pl.Buffered(1))
    except Exception:
        return pl.BlockSpec(shape, index_map)


def prepare_params(params):
    """One-time layout / precision prep (hoisted out of the hot path).

    * PyTorch (out, in) weights -> (in, out) bf16 for the MXU.
    * Hidden dim zero-padded to a multiple of 128 lanes.  gamma is padded with
      ZEROS (not ones) so padded lanes stay exactly 0 through LayerNorm+relu.
    * Heads fused into one weight with each head padded to 128 output lanes.

    Returns (prepped_arrays, meta) where meta holds static Python ints.
    """
    H, S = params["w1"].shape
    A = params["wm"].shape[0]
    Hp = _round_up(max(H, LANE), LANE)

    def pad2(w, rows, cols):
        return jnp.pad(w, ((0, rows - w.shape[0]), (0, cols - w.shape[1])))

    def pad1(v, n):
        return jnp.pad(v, (0, n - v.shape[0]))

    def stack_v(b, g, be):
        return jnp.stack([pad1(b, Hp), pad1(g, Hp), pad1(be, Hp)]
                         ).astype(jnp.float32)

    wh = jnp.concatenate([pad2(params["wm"].T, Hp, A_PAD),
                          pad2(params["ws"].T, Hp, A_PAD)], axis=1)
    bh = jnp.concatenate([pad1(params["bm"], A_PAD),
                          pad1(params["bs"], A_PAD)])

    prepped = {
        "w1": pad2(params["w1"].T, S, Hp).astype(jnp.bfloat16),    # (S, Hp)
        "v1": stack_v(params["b1"], params["g1"], params["be1"]),  # (3, Hp)
        "w2": pad2(params["w2"].T, Hp, Hp).astype(jnp.bfloat16),   # (Hp, Hp)
        "v2": stack_v(params["b2"], params["g2"], params["be2"]),  # (3, Hp)
        "wh": wh.astype(jnp.bfloat16),                             # (Hp, 2*A_PAD)
        "bh": bh.reshape(1, 2 * A_PAD).astype(jnp.float32),        # (1, 2*A_PAD)
    }
    meta = {"h_true": int(H), "action_dim": int(A)}
    return prepped, meta


def _pick_tb(batch):
    """Batch tile: multiple of 16 rows (bf16 sublane tile), capped at 512
    rows, with >= 2 grid steps whenever the batch allows it so v7x's two
    TensorCores both engage under dimension_semantics=("parallel",)."""
    if batch < 32 or batch % 16 != 0:
        return batch                       # tiny / ragged batch: single block
    tb = min(512, (batch // 2 // 16) * 16)
    while tb >= 16 and batch % tb != 0:
        tb -= 16
    return tb if tb >= 16 else batch


@functools.partial(jax.jit, static_argnames=("h_true", "action_dim"))
def actor_forward(state, prepped, *, h_true, action_dim):
    """Pallas-backed forward.  Returns (mean, std) like the continuous branch."""
    B, S = state.shape
    Hp = prepped["w1"].shape[1]
    TB = _pick_tb(B)
    grid = (B // TB,)

    kernel = functools.partial(actor_kernel, inv_h=1.0 / h_true, a_pad=A_PAD)

    mean_p, std_p = pl.pallas_call(
        kernel,
        out_shape=(jax.ShapeDtypeStruct((B, A_PAD), jnp.float32),
                   jax.ShapeDtypeStruct((B, A_PAD), jnp.float32)),
        grid=grid,
        in_specs=[
            pl.BlockSpec((TB, S), lambda i: (i, 0)),   # per-step batch rows
            _const_spec((S, Hp)),                      # weights: resident
            _const_spec((3, Hp)),
            _const_spec((Hp, Hp)),
            _const_spec((3, Hp)),
            _const_spec((Hp, 2 * A_PAD)),
            _const_spec((1, 2 * A_PAD)),
        ],
        out_specs=(pl.BlockSpec((TB, A_PAD), lambda i: (i, 0)),
                   pl.BlockSpec((TB, A_PAD), lambda i: (i, 0))),
        compiler_params=pltpu.CompilerParams(
            dimension_semantics=("parallel",)),
    )(state.astype(jnp.bfloat16),        # host-side bf16 cast: halves input DMA
      prepped["w1"], prepped["v1"], prepped["w2"], prepped["v2"],
      prepped["wh"], prepped["bh"])

    return mean_p[:, :action_dim], std_p[:, :action_dim]


# --------------------------------------------------------------------------
# Parameter construction + references
# --------------------------------------------------------------------------
def make_params(key, state_dim, action_dim, hidden_dim):
    """Deterministic synthetic parameters (PyTorch weight layout: (out, in))."""
    ks = jax.random.split(key, 4)

    def lin(k, out_f, in_f):
        kw, kb = jax.random.split(k)
        bound = 1.0 / jnp.sqrt(in_f)
        w = jax.random.uniform(kw, (out_f, in_f), jnp.float32, -bound, bound)
        b = jax.random.uniform(kb, (out_f,), jnp.float32, -bound, bound)
        return w, b

    w1, b1 = lin(ks[0], hidden_dim, state_dim)
    w2, b2 = lin(ks[1], hidden_dim, hidden_dim)
    wm, bm = lin(ks[2], action_dim, hidden_dim)
    ws, bs = lin(ks[3], action_dim, hidden_dim)
    return {
        "w1": w1, "b1": b1,
        "g1": jnp.ones((hidden_dim,), jnp.float32),
        "be1": jnp.zeros((hidden_dim,), jnp.float32),
        "w2": w2, "b2": b2,
        "g2": jnp.ones((hidden_dim,), jnp.float32),
        "be2": jnp.zeros((hidden_dim,), jnp.float32),
        "wm": wm, "bm": bm,
        "ws": ws, "bs": bs,
    }


def actor_forward_ref_f32(state, params):
    """Pure-JAX f32 reference replicating PyTorch forward (continuous=True)."""
    eps = 1e-5

    def ln(h, g, b):
        mu = jnp.mean(h, axis=-1, keepdims=True)
        var = jnp.mean((h - mu) ** 2, axis=-1, keepdims=True)
        return (h - mu) / jnp.sqrt(var + eps) * g + b

    h = state @ params["w1"].T + params["b1"]
    h = jnp.maximum(ln(h, params["g1"], params["be1"]), 0.0)
    h = h @ params["w2"].T + params["b2"]
    h = jnp.maximum(ln(h, params["g2"], params["be2"]), 0.0)
    mean = h @ params["wm"].T + params["bm"]
    std = jnp.exp(h @ params["ws"].T + params["bs"])
    return mean, std


def actor_forward_ref_matched(state, prepped, h_true, action_dim):
    """Reference using the same padded bf16-matmul / one-pass-LN math as the
    kernel (validates the Pallas plumbing itself)."""
    eps = 1e-5
    inv_h = 1.0 / h_true

    def ln_relu(h, v):
        h = h + v[0:1]
        mu = jnp.sum(h, -1, keepdims=True) * inv_h
        var = jnp.maximum(jnp.sum(h * h, -1, keepdims=True) * inv_h - mu * mu,
                          0.0)
        h = (h - mu) * (jax.lax.rsqrt(var + eps) * v[1:2]) + v[2:3]
        return jnp.maximum(h, 0.0)

    h = jnp.dot(state.astype(jnp.bfloat16), prepped["w1"],
                preferred_element_type=jnp.float32)
    h = ln_relu(h, prepped["v1"])
    h = jnp.dot(h.astype(jnp.bfloat16), prepped["w2"],
                preferred_element_type=jnp.float32)
    h = ln_relu(h, prepped["v2"])
    head = jnp.dot(h.astype(jnp.bfloat16), prepped["wh"],
                   preferred_element_type=jnp.float32) + prepped["bh"]
    mean = head[:, :action_dim]
    std = jnp.exp(head[:, A_PAD:A_PAD + action_dim])
    return mean, std


# --------------------------------------------------------------------------
if __name__ == "__main__":
    key = jax.random.PRNGKey(0)
    k_params, k_state = jax.random.split(key)

    batch, state_dim, action_dim, hidden_dim = 8, 16, 4, 32
    params = make_params(k_params, state_dim, action_dim, hidden_dim)
    prepped, meta = prepare_params(params)          # one-time layout prep
    state = jax.random.normal(k_state, (batch, state_dim), jnp.float32)

    mean, std = actor_forward(state, prepped, **meta)
    jax.block_until_ready((mean, std))
    assert mean.shape == (batch, action_dim) and std.shape == (batch, action_dim)

    # Tight check vs. a reference using the same (padded, bf16 matmul,
    # one-pass LN) math: validates the Pallas plumbing itself.
    m_ref, s_ref = actor_forward_ref_matched(state, prepped,
                                             meta["h_true"], meta["action_dim"])
    assert jnp.allclose(mean, m_ref, atol=1e-3, rtol=1e-3)
    assert jnp.allclose(std, s_ref, atol=1e-3, rtol=1e-3)

    # Looser check vs. the exact f32 PyTorch-semantics reference (bf16 matmul
    # operands introduce ~0.2% relative error, amplified through exp for std —
    # accepted tolerance for downstream consumers).
    m32, s32 = actor_forward_ref_f32(state, params)
    assert jnp.allclose(mean, m32, atol=5e-2, rtol=5e-2)
    assert jnp.allclose(std, s32, atol=5e-2, rtol=5e-2)

    # TODO(synk): get_action's Normal.rsample / tanh-squash log-prob sampling
    # (and the discrete Categorical branch) is stochastic host-side glue, not
    # implemented in the kernel.
    print("KERNEL_OK")
</pallas_src>

<mosaic_0001>
module attributes {stable_mosaic.version = 11 : i64} {
  func.func @actor_kernel(%arg0: i32, %arg1: memref<8x16xbf16, #tpu.memory_space<vmem>>, %arg2: memref<16x128xbf16, #tpu.memory_space<vmem>>, %arg3: memref<3x128xf32, #tpu.memory_space<vmem>>, %arg4: memref<128x128xbf16, #tpu.memory_space<vmem>>, %arg5: memref<3x128xf32, #tpu.memory_space<vmem>>, %arg6: memref<128x256xbf16, #tpu.memory_space<vmem>>, %arg7: memref<1x256xf32, #tpu.memory_space<vmem>>, %arg8: memref<8x128xf32, #tpu.memory_space<vmem>>, %arg9: memref<8x128xf32, #tpu.memory_space<vmem>>) attributes {dimension_semantics = [#tpu.dimension_semantics<parallel>], iteration_bounds = array<i64: 1>, scalar_prefetch = 0 : i64, scratch_operands = 0 : i64, tpu.core_type = #tpu.core_type<tc>, window_params = [{transform_indices = @transform_0, window_bounds = array<i64: 8, 16>}, {pipeline_mode = #tpu.pipeline_mode<synchronous>, transform_indices = @transform_1, window_bounds = array<i64: 16, 128>}, {pipeline_mode = #tpu.pipeline_mode<synchronous>, transform_indices = @transform_2, window_bounds = array<i64: 3, 128>}, {pipeline_mode = #tpu.pipeline_mode<synchronous>, transform_indices = @transform_3, window_bounds = array<i64: 128, 128>}, {pipeline_mode = #tpu.pipeline_mode<synchronous>, transform_indices = @transform_4, window_bounds = array<i64: 3, 128>}, {pipeline_mode = #tpu.pipeline_mode<synchronous>, transform_indices = @transform_5, window_bounds = array<i64: 128, 256>}, {pipeline_mode = #tpu.pipeline_mode<synchronous>, transform_indices = @transform_6, window_bounds = array<i64: 1, 256>}, {transform_indices = @transform_7, window_bounds = array<i64: 8, 128>}, {transform_indices = @transform_8, window_bounds = array<i64: 8, 128>}]} {
    %c0 = arith.constant 0 : index
    %c0_0 = arith.constant 0 : index
    %0 = vector.load %arg1[%c0, %c0_0] : memref<8x16xbf16, #tpu.memory_space<vmem>>, vector<8x16xbf16>
    %c0_1 = arith.constant 0 : index
    %c0_2 = arith.constant 0 : index
    %1 = vector.load %arg2[%c0_1, %c0_2] : memref<16x128xbf16, #tpu.memory_space<vmem>>, vector<16x128xbf16>
    %cst = arith.constant dense<0.000000e+00> : vector<8x128xf32>
    %2 = tpu.matmul %0, %1, %cst {dimension_numbers = #tpu.dot_dimension_numbers<[1], [0], [0], [1], [0, 0, 1, 1], [], []>} : vector<8x16xbf16>, vector<16x128xbf16>, vector<8x128xf32> -> vector<8x128xf32>
    %c0_3 = arith.constant 0 : index
    %c0_4 = arith.constant 0 : index
    %3 = vector.load %arg3[%c0_3, %c0_4] : memref<3x128xf32, #tpu.memory_space<vmem>>, vector<3x128xf32>
    %4 = vector.extract_strided_slice %3 {offsets = [0, 0], sizes = [1, 128], strides = [1, 1]} : vector<3x128xf32> to vector<1x128xf32>
    %5 = vector.extract_strided_slice %3 {offsets = [1, 0], sizes = [1, 128], strides = [1, 1]} : vector<3x128xf32> to vector<1x128xf32>
    %6 = vector.extract_strided_slice %3 {offsets = [2, 0], sizes = [1, 128], strides = [1, 1]} : vector<3x128xf32> to vector<1x128xf32>
    %7 = vector.broadcast %4 : vector<1x128xf32> to vector<8x128xf32>
    %8 = arith.addf %2, %7 : vector<8x128xf32>
    %cst_5 = arith.constant dense<0.000000e+00> : vector<8xf32>
    %9 = vector.multi_reduction <add>, %8, %cst_5 [1] : vector<8x128xf32> to vector<8xf32>
    %10 = vector.shape_cast %9 : vector<8xf32> to vector<8x1xf32>
    %11 = arith.mulf %8, %8 : vector<8x128xf32>
    %cst_6 = arith.constant dense<0.000000e+00> : vector<8xf32>
    %12 = vector.multi_reduction <add>, %11, %cst_6 [1] : vector<8x128xf32> to vector<8xf32>
    %13 = vector.shape_cast %12 : vector<8xf32> to vector<8x1xf32>
    %cst_7 = arith.constant 3.125000e-02 : f32
    %14 = vector.broadcast %cst_7 : f32 to vector<8x1xf32>
    %15 = arith.mulf %10, %14 : vector<8x1xf32>
    %cst_8 = arith.constant 3.125000e-02 : f32
    %16 = vector.broadcast %cst_8 : f32 to vector<8x1xf32>
    %17 = arith.mulf %13, %16 : vector<8x1xf32>
    %18 = arith.mulf %15, %15 : vector<8x1xf32>
    %19 = arith.subf %17, %18 : vector<8x1xf32>
    %cst_9 = arith.constant 0.000000e+00 : f32
    %20 = vector.broadcast %cst_9 : f32 to vector<8x1xf32>
    %21 = arith.maximumf %19, %20 : vector<8x1xf32>
    %cst_10 = arith.constant 9.99999974E-6 : f32
    %22 = vector.broadcast %cst_10 : f32 to vector<8x1xf32>
    %23 = arith.addf %21, %22 : vector<8x1xf32>
    %24 = math.rsqrt %23 : vector<8x1xf32>
    %25 = vector.broadcast %24 : vector<8x1xf32> to vector<8x128xf32>
    %26 = vector.broadcast %5 : vector<1x128xf32> to vector<8x128xf32>
    %27 = arith.mulf %25, %26 : vector<8x128xf32>
    %28 = vector.broadcast %15 : vector<8x1xf32> to vector<8x128xf32>
    %29 = arith.subf %8, %28 : vector<8x128xf32>
    %30 = arith.mulf %29, %27 : vector<8x128xf32>
    %31 = vector.broadcast %6 : vector<1x128xf32> to vector<8x128xf32>
    %32 = arith.addf %30, %31 : vector<8x128xf32>
    %cst_11 = arith.constant 0.000000e+00 : f32
    %33 = vector.broadcast %cst_11 : f32 to vector<8x128xf32>
    %34 = arith.maximumf %32, %33 : vector<8x128xf32>
    %35 = arith.truncf %34 : vector<8x128xf32> to vector<8x128xbf16>
    %c0_12 = arith.constant 0 : index
    %c0_13 = arith.constant 0 : index
    %36 = vector.load %arg4[%c0_12, %c0_13] : memref<128x128xbf16, #tpu.memory_space<vmem>>, vector<128x128xbf16>
    %cst_14 = arith.constant dense<0.000000e+00> : vector<8x128xf32>
    %37 = tpu.matmul %35, %36, %cst_14 {dimension_numbers = #tpu.dot_dimension_numbers<[1], [0], [0], [1], [0, 0, 1, 1], [], []>} : vector<8x128xbf16>, vector<128x128xbf16>, vector<8x128xf32> -> vector<8x128xf32>
    %c0_15 = arith.constant 0 : index
    %c0_16 = arith.constant 0 : index
    %38 = vector.load %arg5[%c0_15, %c0_16] : memref<3x128xf32, #tpu.memory_space<vmem>>, vector<3x128xf32>
    %39 = vector.extract_strided_slice %38 {offsets = [0, 0], sizes = [1, 128], strides = [1, 1]} : vector<3x128xf32> to vector<1x128xf32>
    %40 = vector.extract_strided_slice %38 {offsets = [1, 0], sizes = [1, 128], strides = [1, 1]} : vector<3x128xf32> to vector<1x128xf32>
    %41 = vector.extract_strided_slice %38 {offsets = [2, 0], sizes = [1, 128], strides = [1, 1]} : vector<3x128xf32> to vector<1x128xf32>
    %42 = vector.broadcast %39 : vector<1x128xf32> to vector<8x128xf32>
    %43 = arith.addf %37, %42 : vector<8x128xf32>
    %cst_17 = arith.constant dense<0.000000e+00> : vector<8xf32>
    %44 = vector.multi_reduction <add>, %43, %cst_17 [1] : vector<8x128xf32> to vector<8xf32>
    %45 = vector.shape_cast %44 : vector<8xf32> to vector<8x1xf32>
    %46 = arith.mulf %43, %43 : vector<8x128xf32>
    %cst_18 = arith.constant dense<0.000000e+00> : vector<8xf32>
    %47 = vector.multi_reduction <add>, %46, %cst_18 [1] : vector<8x128xf32> to vector<8xf32>
    %48 = vector.shape_cast %47 : vector<8xf32> to vector<8x1xf32>
    %cst_19 = arith.constant 3.125000e-02 : f32
    %49 = vector.broadcast %cst_19 : f32 to vector<8x1xf32>
    %50 = arith.mulf %45, %49 : vector<8x1xf32>
    %cst_20 = arith.constant 3.125000e-02 : f32
    %51 = vector.broadcast %cst_20 : f32 to vector<8x1xf32>
    %52 = arith.mulf %48, %51 : vector<8x1xf32>
    %53 = arith.mulf %50, %50 : vector<8x1xf32>
    %54 = arith.subf %52, %53 : vector<8x1xf32>
    %cst_21 = arith.constant 0.000000e+00 : f32
    %55 = vector.broadcast %cst_21 : f32 to vector<8x1xf32>
    %56 = arith.maximumf %54, %55 : vector<8x1xf32>
    %cst_22 = arith.constant 9.99999974E-6 : f32
    %57 = vector.broadcast %cst_22 : f32 to vector<8x1xf32>
    %58 = arith.addf %56, %57 : vector<8x1xf32>
    %59 = math.rsqrt %58 : vector<8x1xf32>
    %60 = vector.broadcast %59 : vector<8x1xf32> to vector<8x128xf32>
    %61 = vector.broadcast %40 : vector<1x128xf32> to vector<8x128xf32>
    %62 = arith.mulf %60, %61 : vector<8x128xf32>
    %63 = vector.broadcast %50 : vector<8x1xf32> to vector<8x128xf32>
    %64 = arith.subf %43, %63 : vector<8x128xf32>
    %65 = arith.mulf %64, %62 : vector<8x128xf32>
    %66 = vector.broadcast %41 : vector<1x128xf32> to vector<8x128xf32>
    %67 = arith.addf %65, %66 : vector<8x128xf32>
    %cst_23 = arith.constant 0.000000e+00 : f32
    %68 = vector.broadcast %cst_23 : f32 to vector<8x128xf32>
    %69 = arith.maximumf %67, %68 : vector<8x128xf32>
    %70 = arith.truncf %69 : vector<8x128xf32> to vector<8x128xbf16>
    %c0_24 = arith.constant 0 : index
    %c0_25 = arith.constant 0 : index
    %71 = vector.load %arg6[%c0_24, %c0_25] : memref<128x256xbf16, #tpu.memory_space<vmem>>, vector<128x256xbf16>
    %cst_26 = arith.constant dense<0.000000e+00> : vector<8x256xf32>
    %72 = tpu.matmul %70, %71, %cst_26 {dimension_numbers = #tpu.dot_dimension_numbers<[1], [0], [0], [1], [0, 0, 1, 1], [], []>} : vector<8x128xbf16>, vector<128x256xbf16>, vector<8x256xf32> -> vector<8x256xf32>
    %c0_27 = arith.constant 0 : index
    %c0_28 = arith.constant 0 : index
    %73 = vector.load %arg7[%c0_27, %c0_28] : memref<1x256xf32, #tpu.memory_space<vmem>>, vector<1x256xf32>
    %74 = vector.broadcast %73 : vector<1x256xf32> to vector<8x256xf32>
    %75 = arith.addf %72, %74 : vector<8x256xf32>
    %76 = vector.extract_strided_slice %75 {offsets = [0, 0], sizes = [8, 128], strides = [1, 1]} : vector<8x256xf32> to vector<8x128xf32>
    %c0_29 = arith.constant 0 : index
    %c0_30 = arith.constant 0 : index
    %77 = vector.load %arg8[%c0_29, %c0_30] : memref<8x128xf32, #tpu.memory_space<vmem>>, vector<8x128xf32>
    tpu.vector_store %arg8[%c0_29, %c0_30], %76 {strides = array<i32>} : memref<8x128xf32, #tpu.memory_space<vmem>>, vector<8x128xf32>,
    %78 = vector.extract_strided_slice %75 {offsets = [0, 128], sizes = [8, 128], strides = [1, 1]} : vector<8x256xf32> to vector<8x128xf32>
    %79 = math.exp %78 : vector<8x128xf32>
    %c0_31 = arith.constant 0 : index
    %c0_32 = arith.constant 0 : index
    %80 = vector.load %arg9[%c0_31, %c0_32] : memref<8x128xf32, #tpu.memory_space<vmem>>, vector<8x128xf32>
    tpu.vector_store %arg9[%c0_31, %c0_32], %79 {strides = array<i32>} : memref<8x128xf32, #tpu.memory_space<vmem>>, vector<8x128xf32>,
    return
  }
  func.func @transform_0(%arg0: i32) -> (i32, i32) {
    %c0_i32 = arith.constant 0 : i32
    %c0_i32_0 = arith.constant 0 : i32
    return %arg0, %c0_i32 : i32, i32
  }
  func.func @transform_1(%arg0: i32) -> (i32, i32) {
    %c0_i32 = arith.constant 0 : i32
    %c0_i32_0 = arith.constant 0 : i32
    %c0_i32_1 = arith.constant 0 : i32
    return %c0_i32, %c0_i32_0 : i32, i32
  }
  func.func @transform_2(%arg0: i32) -> (i32, i32) {
    %c0_i32 = arith.constant 0 : i32
    %c0_i32_0 = arith.constant 0 : i32
    %c0_i32_1 = arith.constant 0 : i32
    return %c0_i32, %c0_i32_0 : i32, i32
  }
  func.func @transform_3(%arg0: i32) -> (i32, i32) {
    %c0_i32 = arith.constant 0 : i32
    %c0_i32_0 = arith.constant 0 : i32
    %c0_i32_1 = arith.constant 0 : i32
    return %c0_i32, %c0_i32_0 : i32, i32
  }
  func.func @transform_4(%arg0: i32) -> (i32, i32) {
    %c0_i32 = arith.constant 0 : i32
    %c0_i32_0 = arith.constant 0 : i32
    %c0_i32_1 = arith.constant 0 : i32
    return %c0_i32, %c0_i32_0 : i32, i32
  }
  func.func @transform_5(%arg0: i32) -> (i32, i32) {
    %c0_i32 = arith.constant 0 : i32
    %c0_i32_0 = arith.constant 0 : i32
    %c0_i32_1 = arith.constant 0 : i32
    return %c0_i32, %c0_i32_0 : i32, i32
  }
  func.func @transform_6(%arg0: i32) -> (i32, i32) {
    %c0_i32 = arith.constant 0 : i32
    %c0_i32_0 = arith.constant 0 : i32
    %c0_i32_1 = arith.constant 0 : i32
    return %c0_i32, %c0_i32_0 : i32, i32
  }
  func.func @transform_7(%arg0: i32) -> (i32, i32) {
    %c0_i32 = arith.constant 0 : i32
    %c0_i32_0 = arith.constant 0 : i32
    return %arg0, %c0_i32 : i32, i32
  }
  func.func @transform_8(%arg0: i32) -> (i32, i32) {
    %c0_i32 = arith.constant 0 : i32
    %c0_i32_0 = arith.constant 0 : i32
    return %arg0, %c0_i32 : i32, i32
  }
}

</mosaic_0001>

<bundles_post_ra>
// kernel: actor_forward.1
= control target key start
LH: loop header
LB: loop body
LE: loop exit
PB: predicated region body
PF: predicated region fallthrough
CT: control target
= control target key end

     0   :  { %14 = vsyncpa [#allocation3], 0  ;;  %s716_s0 = inlined_call_operand.vmem [shape: bf16[8,16], index: 0, kind: input, shape index: {}]   ;;  %s717_s1 = inlined_call_operand.vmem [shape: bf16[16,128], index: 1, kind: input, shape index: {}]   ;;  %s718_s2 = inlined_call_operand.vmem [shape: f32[3,128], index: 2, kind: input, shape index: {}]   ;;  %s719_s3 = inlined_call_operand.hbm [shape: bf16[128,128], index: 3, kind: input, shape index: {}]   ;;  %s720_s4 = inlined_call_operand.vmem [shape: f32[3,128], index: 4, kind: input, shape index: {}]   ;;  %s721_s5 = inlined_call_operand.hbm [shape: bf16[128,256], index: 5, kind: input, shape index: {}]   ;;  %s722_s6 = inlined_call_operand.vmem [shape: f32[1,256], index: 6, kind: input, shape index: {}]   ;;  %s723_s7 = inlined_call_operand.vmem [shape: f32[8,128], index: 7, kind: output, shape index: {0}]   ;;  %s724_s8 = inlined_call_operand.vmem [shape: f32[8,128], index: 8, kind: output, shape index: {1}]  }
   0x1   :  { %15 = vsyncpa [#allocation5], 0  ;;  %s598_s27 = smov [#allocation2]   ;;  %s550_s9 = scalar_lea.hbm %s719_s3, 1024 }
   0x2   :  { %s27_s28 = sshll.u32 %s598_s27, 4  ;;  %p551_p0 = scmp.ne.s32.totalorder %s719_s3, %s550_s9  ;;  %s28_s28 = int_to_ptr.vmem [resolvable:$true] %s27_s28 }
   0x3   :  { %p554_p1 = scmp.lt.u32.totalorder %s550_s9, %s719_s3 }
   0x5   :  { %p556_p2 = pnand %p554_p1, %p551_p0 }
   0x7   :  { %559 = shalt.err (!%p556_p2)
}
   0x8   :  { %s560_s14 = scalar_lea.vmem %s28_s28, 1024  ;;  %p565_p4 = scmp.lt.s32.totalorder %s28_s28, %s28_s28 }
   0x9   :  { %p561_p3 = scmp.ne.s32.totalorder %s28_s28, %s560_s14  ;;  %p566_p5 = scmp.lt.s32.totalorder %s560_s14, %s560_s14 }
   0xb   :  { %p567_p6 = por %p566_p5, %p565_p4 }
   0xd   :  { %p568_p7 = pnand %p567_p6, %p561_p3 }
   0xf   :  { %571 = shalt.err (!%p568_p7)
}
  0x10   :  { %s599_s15 = smov 64   ;;  %s600_s16 = smov 4  }
  0x11   :  { %33 = dma.hbm_to_vmem [thread:$0]  %s719_s3, 1024, %s28_s28, [#allocation3], %s599_s15, %s599_s15, %s600_s16  }
  0x12   :  { %s601_s19 = smov [#allocation4]   ;;  %s572_s23 = scalar_lea.hbm %s721_s5, 2048 }
  0x13   :  { %s41_s20 = sshll.u32 %s601_s19, 4  ;;  %p573_p8 = scmp.ne.s32.totalorder %s721_s5, %s572_s23  ;;  %s42_s20 = int_to_ptr.vmem [resolvable:$true] %s41_s20 }
  0x14   :  { %p576_p9 = scmp.lt.u32.totalorder %s572_s23, %s721_s5 }
  0x16   :  { %p578_p10 = pnand %p576_p9, %p573_p8 }
  0x18   :  { %581 = shalt.err (!%p578_p10)
}
  0x19   :  { %s582_s29 = scalar_lea.vmem %s42_s20, 2048  ;;  %p587_p12 = scmp.lt.s32.totalorder %s42_s20, %s42_s20 }
  0x1a   :  { %p583_p11 = scmp.ne.s32.totalorder %s42_s20, %s582_s29  ;;  %p588_p13 = scmp.lt.s32.totalorder %s582_s29, %s582_s29 }
  0x1c   :  { %p589_p0 = por %p588_p13, %p587_p12 }
  0x1e   :  { %p590_p1 = pnand %p589_p0, %p583_p11 }
  0x20   :  { %593 = shalt.err (!%p590_p1)
}
  0x21   :  { %s602_s3 = smov 128   ;;  %s603_s28 = smov 8  }
  0x22   :  { %47 = dma.hbm_to_vmem [thread:$0]  %s721_s5, 2048, %s42_s20, [#allocation5], %s602_s3, %s602_s3, %s603_s28  }
  0x23   :  { %594 = dma.done.wait [#allocation3], 1024  }
  0x24   :  { %595 = vsyncadd [#allocation3], 4294966272 }
  0x25   :  { %596 = dma.done.wait [#allocation5], 2048  }
  0x26   :  { %597 = vsyncadd [#allocation5], 4294965248  ;;  %v604_v0 = vmov 0.0   ;;  %vm605_vm0 = vmmov 0   ;;  %v511_v1 = vld [vmem:[%s717_s1] sm:$0xff]   ;;  %vm71_vm1 = vcmask 130048   ;;  %v61_v3 = vlaneseq }
  0x27   :  { %476 = vmatprep.subr.bf16.mxu0 %v604_v0  ;;  %478 = vmatprep.mubr.msk.bf16.mxu0 %vm605_vm0, %v604_v0  ;;  %v57_v2 = vld [vmem:[%s716_s0] sm:$0xf]  ;;  %v513_v15 = vld [vmem:[#allocation2 + $0x8] sm:$0xff]   ;;  %v514_v16 = vld [vmem:[#allocation2 + $0x10] sm:$0xff]   ;;  %v606_v60 = vmov 0  }
  0x28   :  { %482 = vmatprep.subr.bf16.mxu1 %v604_v0  ;;  %498 = vmatprep.mubr.msk.bf16.mxu1 %vm605_vm0, %v604_v0  ;;  %v682_v4 = vshrl.u32 %v61_v3, 7  ;;  %v60_v6 = vld [vmem:[%s718_s2] sm:$0x7]  ;;  %v515_v17 = vld [vmem:[#allocation2 + $0x18] sm:$0xff]   ;;  %v517_v19 = vld [vmem:[#allocation2 + $0x28] sm:$0xff]  }
  0x29   :  { %477 = vmatpush3.bf16.msra.mxu0 %v511_v1  ;;  %v512_v14 = vld [vmem:[#allocation2] sm:$0xff]   ;;  %v518_v20 = vld [vmem:[#allocation2 + $0x30] sm:$0xff]   ;;  %v519_v21 = vld [vmem:[#allocation2 + $0x38] sm:$0xff]  }
  0x2a   :  { %v685_v5 = vsub.s32 0, %v682_v4  ;;  %483 = vmatpush3.bf16.msra.mxu1 %v512_v14  ;;  %v516_v18 = vld [vmem:[#allocation2 + $0x20] sm:$0xff]   ;;  %v692_v30 = vsub.s32 1, %v682_v4  ;;  %v136_v32 = vsub.s32 2, %v682_v4  ;;  %v525_v51 = vld [vmem:[#allocation4 + $0x14] ss:$8 sps:$4 sm:$0xff]  }
  0x2b   :  { %484 = vmatprep.subr.bf16.mxu1 %v604_v0  ;;  %v157_v41 = vld [vmem:[%s720_s4] sm:$0x7]  ;;  %v522_v49 = vld [vmem:[#allocation4 + $0x4] ss:$8 sps:$4 sm:$0xff]   ;;  %v523_v52 = vld [vmem:[#allocation4 + $0x10] ss:$8 sps:$4 sm:$0xff]  }
  0x2c   :  { %479 = vmatmul.mubr.msk.bf16.vlgmr.msra.gmra.mrb[0].mxu0 %vm71_vm1, %v57_v2  ;;  %v64_v7 = vrot.slane %v60_v6, %v685_v5  ;;  %v130_v31 = vrot.slane %v60_v6, %v692_v30  ;;  %v137_v36 = vrot.slane %v60_v6, %v136_v32  ;;  %v161_v42 = vrot.slane %v157_v41, %v685_v5  ;;  %v520_v50 = vld [vmem:[#allocation4] ss:$8 sps:$4 sm:$0xff]   ;;  %v528_v53 = vld [vmem:[#allocation4 + $0x24] ss:$8 sps:$4 sm:$0xff]   ;;  %v531_v55 = vld [vmem:[#allocation4 + $0x34] ss:$8 sps:$4 sm:$0xff]  }
  0x2d   :  { %384 = vmatprep.subr.bf16.mxu0 %v522_v49  ;;  %v526_v54 = vld [vmem:[#allocation4 + $0x20] ss:$8 sps:$4 sm:$0xff]   ;;  %v529_v56 = vld [vmem:[#allocation4 + $0x30] ss:$8 sps:$4 sm:$0xff]   ;;  %v534_v57 = vld [vmem:[#allocation4 + $0x44] ss:$8 sps:$4 sm:$0xff]   ;;  %416 = vmatprep.mubr.bf16.mxu0 %v606_v60  ;;  %v272_v14 = vrot.slane %v157_v41, %v136_v32 }
  0x2e   :  { %485 = vmatpush3.bf16.msra.mxu1 %v513_v15  ;;  %385 = vmatpush1.bf16.msra.mxu0 %v520_v50  ;;  %v532_v58 = vld [vmem:[#allocation4 + $0x40] ss:$8 sps:$4 sm:$0xff]   ;;  %v537_v59 = vld [vmem:[#allocation4 + $0x54] ss:$8 sps:$4 sm:$0xff]   ;;  %v535_v61 = vld [vmem:[#allocation4 + $0x50] ss:$8 sps:$4 sm:$0xff]  }
  0x2f   :  { %486 = vmatprep.subr.bf16.mxu1 %v604_v0  ;;  %386 = vmatprep.subr.bf16.mxu0 %v525_v51  ;;  %v540_v62 = vld [vmem:[#allocation4 + $0x64] ss:$8 sps:$4 sm:$0xff]   ;;  %v538_v63 = vld [vmem:[#allocation4 + $0x60] ss:$8 sps:$4 sm:$0xff]   ;;  %v541_v1 = vld [vmem:[#allocation4 + $0x70] ss:$8 sps:$4 sm:$0xff]  }
  0x32   :  { %487 = vmatpush3.bf16.msra.mxu1 %v514_v16  ;;  %387 = vmatpush1.bf16.msra.mxu0 %v523_v52 }
  0x33   :  { %488 = vmatprep.subr.bf16.mxu1 %v604_v0  ;;  %388 = vmatprep.subr.bf16.mxu0 %v528_v53 }
  0x36   :  { %489 = vmatpush3.bf16.msra.mxu1 %v515_v17  ;;  %389 = vmatpush1.bf16.msra.mxu0 %v526_v54 }
  0x37   :  { %490 = vmatprep.subr.bf16.mxu1 %v604_v0  ;;  %390 = vmatprep.subr.bf16.mxu0 %v531_v55 }
  0x3a   :  { %491 = vmatpush3.bf16.msra.mxu1 %v516_v18  ;;  %391 = vmatpush1.bf16.msra.mxu0 %v529_v56 }
  0x3b   :  { %492 = vmatprep.subr.bf16.mxu1 %v604_v0  ;;  %392 = vmatprep.subr.bf16.mxu0 %v534_v57 }
  0x3e   :  { %493 = vmatpush3.bf16.msra.mxu1 %v517_v19  ;;  %393 = vmatpush1.bf16.msra.mxu0 %v532_v58 }
  0x3f   :  { %494 = vmatprep.subr.bf16.mxu1 %v604_v0  ;;  %394 = vmatprep.subr.bf16.mxu0 %v537_v59 }
  0x42   :  { %495 = vmatpush3.bf16.msra.mxu1 %v518_v20  ;;  %395 = vmatpush1.bf16.msra.mxu0 %v535_v61 }
  0x43   :  { %496 = vmatprep.subr.bf16.mxu1 %v604_v0  ;;  %396 = vmatprep.subr.bf16.mxu0 %v540_v62  ;;  %v543_v0 = vld [vmem:[#allocation4 + $0x74] ss:$8 sps:$4 sm:$0xff]  }
  0x46   :  { %497 = vmatpush3.bf16.msra.mxu1 %v519_v21  ;;  %397 = vmatpush1.bf16.msra.mxu0 %v538_v63  ;;  %v292_v21 = vld [vmem:[%s722_s6] sm:$0x3] }
  0x47   :  { %398 = vmatprep.subr.bf16.mxu0 %v543_v0 }
  0x4a   :  { %399 = vmatpush1.bf16.msra.mxu0 %v541_v1 }
  0xff   :  { %v109_v8 = vpop.f32.mrb[0].mxu0 }
 0x100   :  { %v110_v9 = vadd.f32 %v109_v8, %v64_v7  ;;  %v480_v10 = vpop.f32.mrb[1].mxu0 }
 0x101   :  { %v112_v11 = vpop.f32.mrb[2].mxu0 }
 0x102   :  { %115 = vadd.xlane.f32.xlu0 %v110_v9  ;;  %v481_v12 = vpop.f32.mrb[3].mxu0  ;;  %v117_v13 = vmul.f32 %v110_v9, %v110_v9 }
 0x103   :  { %v265_v12 = vrot.slane %v157_v41, %v692_v30 }
 0x106   :  { %118 = vadd.xlane.f32.xlu0 %v117_v13 }
 0x18f   :  { %v116_v22 = vpop.xlane.xlu0 %115 }
 0x190   :  { %v120_v23 = vmul.f32 0.03125, %v116_v22  ;;  %v297_v22 = vrot.slane %v292_v21, %v685_v5 }
 0x192   :  { %v122_v25 = vmul.f32 %v120_v23, %v120_v23  ;;  %v132_v34 = vsub.f32 %v110_v9, %v120_v23  ;;  %v301_v23 = vrot.slane %v292_v21, %v692_v30 }
 0x193   :  { %v119_v24 = vpop.xlane.xlu0 %118 }
 0x194   :  { %v121_v26 = vmul.f32 0.03125, %v119_v24 }
 0x196   :  { %v123_v27 = vsub.f32 %v121_v26, %v122_v25 }
 0x198   :  { %v124_v28 = vmax.f32 %v123_v27, 0.0 }
 0x19a   :  { %v125_v29 = vadd.f32 1e-05, %v124_v28 }
 0x19c   :  { %544 = vrsqrt.f32 %v125_v29 }
 0x1a6   :  { %v545_v33 = vpop.eup %544 }
 0x1a7   :  { %v131_v35 = vmul.f32 %v545_v33, %v130_v31 }
 0x1a9   :  { %v133_v37 = vmul.f32 %v132_v34, %v131_v35 }
 0x1ab   :  { %v138_v38 = vadd.f32 %v137_v36, %v133_v37 }
 0x1ad   :  { %v139_v39 = vmax.f32 %v138_v38, 0.0 }
 0x1af   :  { %v140_v40 = vpack.c.bf16 %v139_v39, %v139_v39 }
 0x1b1   :  { %499 = vmatmul.mubr.bf16.vlgmr.msra.gmra.mrb[0].mxu1 %v140_v40 }
 0x284   :  { %v244_v43 = vpop.f32.mrb[0].mxu1 }
 0x285   :  { %v245_v44 = vadd.f32 %v244_v43, %v161_v42  ;;  %v500_v45 = vpop.f32.mrb[1].mxu1 }
 0x286   :  { %v247_v46 = vpop.f32.mrb[2].mxu1 }
 0x287   :  { %250 = vadd.xlane.f32.xlu1 %v245_v44  ;;  %v501_v47 = vpop.f32.mrb[3].mxu1  ;;  %v252_v48 = vmul.f32 %v245_v44, %v245_v44 }
 0x28b   :  { %253 = vadd.xlane.f32.xlu1 %v252_v48 }
 0x314   :  { %v251_v2 = vpop.xlane.xlu1 %250 }
 0x315   :  { %v255_v3 = vmul.f32 0.03125, %v251_v2 }
 0x317   :  { %v257_v7 = vmul.f32 %v255_v3, %v255_v3  ;;  %v267_v15 = vsub.f32 %v245_v44, %v255_v3 }
 0x318   :  { %v254_v6 = vpop.xlane.xlu1 %253 }
 0x319   :  { %v256_v8 = vmul.f32 0.03125, %v254_v6 }
 0x31b   :  { %v258_v9 = vsub.f32 %v256_v8, %v257_v7 }
 0x31d   :  { %v259_v10 = vmax.f32 %v258_v9, 0.0 }
 0x31f   :  { %v260_v11 = vadd.f32 1e-05, %v259_v10 }
 0x321   :  { %546 = vrsqrt.f32 %v260_v11 }
 0x32b   :  { %v547_v13 = vpop.eup %546 }
 0x32c   :  { %v266_v16 = vmul.f32 %v547_v13, %v265_v12 }
 0x32e   :  { %v268_v17 = vmul.f32 %v267_v15, %v266_v16 }
 0x330   :  { %v273_v18 = vadd.f32 %v272_v14, %v268_v17 }
 0x332   :  { %v274_v19 = vmax.f32 %v273_v18, 0.0 }
 0x334   :  { %v275_v20 = vpack.c.bf16 %v274_v19, %v274_v19 }
 0x336   :  { %417 = vmatmul.mubr.bf16.vlgmr.msra.gmra.mrb[4].mxu0 %v275_v20 }
 0x409   :  { %v418_v24 = vpop.f32.mrb[4].mxu0 }
 0x40a   :  { %v419_v25 = vadd.f32 %v418_v24, %v297_v22  ;;  %v420_v26 = vpop.f32.mrb[5].mxu0 }
 0x40b   :  { %v421_v4 = vadd.f32 %v420_v26, %v301_v23  ;;  %v422_v27 = vpop.f32.mrb[6].mxu0 }
 0x40c   :  { %425 = vst [vmem:[%s723_s7] sm:$0xff] %v419_v25  ;;  %v423_v28 = vpop.f32.mrb[7].mxu0 }
 0x40d   :  { %v426_v29 = vmul.f32 1.442695, %v421_v4 }
 0x40f   :  { %548 = vpow2.f32 %v426_v29 }
 0x419   :  { %v549_v31 = vpop.eup %548 }
 0x41a   :  { %428 = vst [vmem:[%s724_s8] sm:$0xff] %v549_v31 }
 0x41b   :  { %437 = vsyncpa [#allocation3], 1 }
 0x41c   :  { %438 = vsyncpa [#allocation5], 1 }

</bundles_post_ra>
